<compile_context>
chip_gen: v7x
topology: tpu7x:2x2x1
jax: 0.10.0
libtpu: 0.0.40
codegen_flags: <defaults>
</compile_context>

<pallas_src>
import functools

import jax
import jax.numpy as jnp
from jax.experimental import pallas as pl
from jax.experimental.pallas import tpu as pltpu


# ----------------------------- pass 1: per-row CE ---------------------------

def _ce_onehot_kernel(logit_ref, onehot_ref, out_ref):
    """Per-row CE for one (TN, C) tile against a dense (possibly soft) target."""
    x = logit_ref[...].astype(jnp.float32)      # (TN, C)
    t = onehot_ref[...].astype(jnp.float32)     # (TN, C)
    m = jnp.max(x, axis=-1, keepdims=True)                               # (TN, 1)
    lse = m + jnp.log(jnp.sum(jnp.exp(x - m), axis=-1, keepdims=True))   # (TN, 1)
    # sum_c t*(lse - x) == lse*sum_c(t) - sum_c(t*x): avoids a (TN, C)
    # broadcast of lse (one fewer full-tile VPU pass).
    t_sum = jnp.sum(t, axis=-1, keepdims=True)
    tx = jnp.sum(t * x, axis=-1, keepdims=True)
    out_ref[...] = lse * t_sum - tx


def _ce_labels_kernel(logit_ref, label_ref, out_ref):
    """Per-row CE for one (TN, C) tile against int32 class ids (true one-hot)."""
    x = logit_ref[...].astype(jnp.float32)      # (TN, C)
    m = jnp.max(x, axis=-1, keepdims=True)
    lse = m + jnp.log(jnp.sum(jnp.exp(x - m), axis=-1, keepdims=True))
    lbl = label_ref[...]                        # (TN, 1) int32
    col = jax.lax.broadcasted_iota(jnp.int32, x.shape, 1)
    x_at_label = jnp.sum(jnp.where(col == lbl, x, 0.0), axis=-1, keepdims=True)
    out_ref[...] = lse - x_at_label


# ----------------------------- pass 2: top-k mean ---------------------------

def _topk_mean_kernel(loss_ref, out_ref, *, k):
    lv = loss_ref[...]                                     # (1, N) f32, lane-dense
    u = pltpu.bitcast(lv, jnp.uint32)
    # Order-preserving f32 -> uint32 key (robust to negative losses too).
    flip = jnp.where((u >> 31) == 0,
                     jnp.uint32(0x80000000), jnp.uint32(0xFFFFFFFF))
    key = u ^ flip

    # Exact k-th largest key: MSB-first bisection, 2 bits per step; the three
    # candidate counts inside a step are independent and pipeline through the
    # VPU/XLU, leaving only 16 dependent reduce-to-scalar steps.
    kk = jnp.int32(k)
    thr = jnp.uint32(0)
    for shift in range(30, -1, -2):
        c3 = thr | jnp.uint32(3 << shift)
        c2 = thr | jnp.uint32(2 << shift)
        c1 = thr | jnp.uint32(1 << shift)
        n3 = jnp.sum((key >= c3).astype(jnp.int32))
        n2 = jnp.sum((key >= c2).astype(jnp.int32))
        n1 = jnp.sum((key >= c1).astype(jnp.int32))
        bits = jnp.where(n3 >= kk, jnp.uint32(3),
                         jnp.where(n2 >= kk, jnp.uint32(2),
                                   jnp.where(n1 >= kk, jnp.uint32(1),
                                             jnp.uint32(0))))
        thr = thr | (bits << shift)

    gt = key > thr
    cnt_gt = jnp.sum(gt.astype(jnp.float32))
    sum_gt = jnp.sum(jnp.where(gt, lv, jnp.float32(0.0)))
    kth_val = jnp.max(jnp.where(key == thr, lv, -jnp.inf))   # torch tie fill
    total = sum_gt + (jnp.float32(k) - cnt_gt) * kth_val
    out_ref[0, 0] = total * jnp.float32(1.0 / k)


def _ohem_topk_mean(loss_row, k):
    n = loss_row.shape[-1]
    out = pl.pallas_call(
        functools.partial(_topk_mean_kernel, k=k),
        out_shape=jax.ShapeDtypeStruct((1, 1), jnp.float32),
        grid=(1,),
        in_specs=[pl.BlockSpec((1, n), lambda i: (0, 0))],
        out_specs=pl.BlockSpec(memory_space=pltpu.MemorySpace.SMEM),
        compiler_params=pltpu.CompilerParams(
            dimension_semantics=("arbitrary",)),
    )(loss_row)
    return out[0, 0]


# ----------------------------- tiling helpers -------------------------------

def _pick_tile_rows(n, c, itemsize, big_streams):
    """Largest useful row tile: the double-buffered (TN, C) input streams stay
    within ~24 MiB of VMEM (dtype-aware), TN capped at 1024 rows."""
    budget = 24 << 20
    per_row = max(1, big_streams * 2 * c * itemsize)   # streams x double buffer
    tn = min(budget // per_row, 1024)
    if tn >= n:
        return n                       # single (possibly ragged) full block
    tn = max(8, int(tn) // 8 * 8)
    return tn if tn <= n else n


def _vmem_limit_bytes(tn, c, itemsize, big_streams):
    need = big_streams * 2 * tn * c * itemsize    # double-buffered (TN, C) inputs
    need += 2 * 2 * tn * 128 * 4                  # (TN, 1) out/label blocks, lane-padded
    need += 4 << 20                               # headroom for compiler temporaries
    return int(min(max(need, 16 << 20), 60 << 20))


def _validate_tile(n, tn):
    assert tn == n or (tn % 8 == 0 and tn <= n), (
        "tile_rows must equal N or be a multiple of 8 that is <= N")


# ----------------------------- public wrappers ------------------------------

def cross_entropy_onehot_ohem(logits, onehot, top_k=0.5, tile_rows=None):
    """Pallas equivalent of CrossEntropyOnehotLossOHEM(top_k)(logits, onehot).

    logits, onehot: (N, C) float arrays (onehot may be soft). Scalar f32 out.
    """
    n, c = logits.shape
    assert onehot.shape == (n, c)
    k = n if top_k == 1 else int(top_k * n)     # torch: int(top_k * loss.size()[0])
    assert 1 <= k <= n, "top_k * N must be in [1, N]"

    itemsize = max(jnp.dtype(logits.dtype).itemsize,
                   jnp.dtype(onehot.dtype).itemsize)
    tn = tile_rows if tile_rows is not None else _pick_tile_rows(n, c, itemsize, 2)
    _validate_tile(n, tn)

    per_row = pl.pallas_call(
        _ce_onehot_kernel,
        out_shape=jax.ShapeDtypeStruct((n, 1), jnp.float32),
        grid=(pl.cdiv(n, tn),),
        in_specs=[pl.BlockSpec((tn, c), lambda i: (i, 0)),
                  pl.BlockSpec((tn, c), lambda i: (i, 0))],
        out_specs=pl.BlockSpec((tn, 1), lambda i: (i, 0)),
        compiler_params=pltpu.CompilerParams(
            dimension_semantics=("parallel",),
            vmem_limit_bytes=_vmem_limit_bytes(tn, c, itemsize, 2)),
    )(logits, onehot)

    # (N, 1) -> (1, N) is a free row-major re-view in XLA; pass 2 gets a
    # lane-dense operand without any in-kernel sublane->lane relayout.
    return _ohem_topk_mean(per_row.reshape(1, n), k)


def cross_entropy_onehot_ohem_from_labels(logits, labels, top_k=0.5,
                                          tile_rows=None):
    """Fast path when the target is a true one-hot given as int class ids.
    Halves HBM traffic vs the dense one-hot variant (review item #1)."""
    n, c = logits.shape
    k = n if top_k == 1 else int(top_k * n)
    assert 1 <= k <= n, "top_k * N must be in [1, N]"

    itemsize = jnp.dtype(logits.dtype).itemsize
    tn = tile_rows if tile_rows is not None else _pick_tile_rows(n, c, itemsize, 1)
    _validate_tile(n, tn)

    labels2d = labels.reshape(n, 1).astype(jnp.int32)
    per_row = pl.pallas_call(
        _ce_labels_kernel,
        out_shape=jax.ShapeDtypeStruct((n, 1), jnp.float32),
        grid=(pl.cdiv(n, tn),),
        in_specs=[pl.BlockSpec((tn, c), lambda i: (i, 0)),
                  pl.BlockSpec((tn, 1), lambda i: (i, 0))],
        out_specs=pl.BlockSpec((tn, 1), lambda i: (i, 0)),
        compiler_params=pltpu.CompilerParams(
            dimension_semantics=("parallel",),
            vmem_limit_bytes=_vmem_limit_bytes(tn, c, itemsize, 1)),
    )(logits, labels2d)

    return _ohem_topk_mean(per_row.reshape(1, n), k)


# ----------------------------- reference & tests ----------------------------

def _ref_ohem(lg, oh, top_k):
    per = jnp.sum(-jax.nn.log_softmax(lg, axis=1) * oh, axis=1)
    kk = per.shape[0] if top_k == 1 else int(top_k * per.shape[0])
    return jnp.mean(jax.lax.top_k(per, kk)[0])


if __name__ == "__main__":
    key = jax.random.PRNGKey(0)
    ks = jax.random.split(key, 8)

    # Case 1: tiny single-tile, hard one-hot (module's exact interface).
    n1, c1 = 8, 32
    lg1 = jax.random.normal(ks[0], (n1, c1), jnp.float32)
    oh1 = jax.nn.one_hot(jax.random.randint(ks[1], (n1,), 0, c1), c1,
                         dtype=jnp.float32)
    out1 = jax.block_until_ready(cross_entropy_onehot_ohem(lg1, oh1, top_k=0.5))
    ref1 = _ref_ohem(lg1, oh1, 0.5)
    assert jnp.allclose(out1, ref1, rtol=1e-5, atol=1e-5), (float(out1), float(ref1))

    # Case 2: multi-tile grid (3 tiles of 16 rows), soft targets.
    n2, c2 = 48, 40
    lg2 = jax.random.normal(ks[2], (n2, c2), jnp.float32)
    soft2 = jax.nn.softmax(jax.random.normal(ks[3], (n2, c2), jnp.float32), axis=1)
    out2 = jax.block_until_ready(
        cross_entropy_onehot_ohem(lg2, soft2, top_k=0.5, tile_rows=16))
    ref2 = _ref_ohem(lg2, soft2, 0.5)
    assert jnp.allclose(out2, ref2, rtol=1e-5, atol=1e-5), (float(out2), float(ref2))

    # Case 3: ragged N (partial last tile: N=20 with TN=16), hard one-hot.
    n3, c3 = 20, 24
    lg3 = jax.random.normal(ks[4], (n3, c3), jnp.float32)
    oh3 = jax.nn.one_hot(jax.random.randint(ks[5], (n3,), 0, c3), c3,
                         dtype=jnp.float32)
    out3 = jax.block_until_ready(
        cross_entropy_onehot_ohem(lg3, oh3, top_k=0.5, tile_rows=16))
    ref3 = _ref_ohem(lg3, oh3, 0.5)
    assert jnp.allclose(out3, ref3, rtol=1e-5, atol=1e-5), (float(out3), float(ref3))

    # Case 4: labels fast path + bf16 logits (review items #1 and #7).
    n4, c4 = 32, 16
    lbl4 = jax.random.randint(ks[6], (n4,), 0, c4)
    lg4 = jax.random.normal(ks[7], (n4, c4), jnp.float32).astype(jnp.bfloat16)
    out4 = jax.block_until_ready(
        cross_entropy_onehot_ohem_from_labels(lg4, lbl4, top_k=0.25))
    ref4 = _ref_ohem(lg4.astype(jnp.float32),
                     jax.nn.one_hot(lbl4, c4, dtype=jnp.float32), 0.25)
    assert jnp.allclose(out4, ref4, rtol=1e-4, atol=1e-4), (float(out4), float(ref4))

    print("KERNEL_OK")
</pallas_src>

<mosaic_0001>
module attributes {stable_mosaic.version = 11 : i64} {
  func.func @_ce_onehot_kernel(%arg0: i32, %arg1: memref<8x32xf32, #tpu.memory_space<vmem>>, %arg2: memref<8x32xf32, #tpu.memory_space<vmem>>, %arg3: memref<8x1xf32, #tpu.memory_space<vmem>>) attributes {dimension_semantics = [#tpu.dimension_semantics<parallel>], iteration_bounds = array<i64: 1>, scalar_prefetch = 0 : i64, scratch_operands = 0 : i64, tpu.core_type = #tpu.core_type<tc>, window_params = [{transform_indices = @transform_0, window_bounds = array<i64: 8, 32>}, {transform_indices = @transform_1, window_bounds = array<i64: 8, 32>}, {transform_indices = @transform_2, window_bounds = array<i64: 8, 1>}]} {
    %c0 = arith.constant 0 : index
    %c0_0 = arith.constant 0 : index
    %0 = vector.load %arg1[%c0, %c0_0] : memref<8x32xf32, #tpu.memory_space<vmem>>, vector<8x32xf32>
    %c0_1 = arith.constant 0 : index
    %c0_2 = arith.constant 0 : index
    %1 = vector.load %arg2[%c0_1, %c0_2] : memref<8x32xf32, #tpu.memory_space<vmem>>, vector<8x32xf32>
    %cst = arith.constant dense<0xFF800000> : vector<8xf32>
    %2 = vector.multi_reduction <maximumf>, %0, %cst [1] : vector<8x32xf32> to vector<8xf32>
    %3 = vector.shape_cast %2 : vector<8xf32> to vector<8x1xf32>
    %4 = vector.broadcast %3 : vector<8x1xf32> to vector<8x32xf32>
    %5 = arith.subf %0, %4 : vector<8x32xf32>
    %6 = math.exp %5 : vector<8x32xf32>
    %cst_3 = arith.constant dense<0.000000e+00> : vector<8xf32>
    %7 = vector.multi_reduction <add>, %6, %cst_3 [1] : vector<8x32xf32> to vector<8xf32>
    %8 = vector.shape_cast %7 : vector<8xf32> to vector<8x1xf32>
    %9 = math.log %8 : vector<8x1xf32>
    %10 = arith.addf %3, %9 : vector<8x1xf32>
    %cst_4 = arith.constant dense<0.000000e+00> : vector<8xf32>
    %11 = vector.multi_reduction <add>, %1, %cst_4 [1] : vector<8x32xf32> to vector<8xf32>
    %12 = vector.shape_cast %11 : vector<8xf32> to vector<8x1xf32>
    %13 = arith.mulf %1, %0 : vector<8x32xf32>
    %cst_5 = arith.constant dense<0.000000e+00> : vector<8xf32>
    %14 = vector.multi_reduction <add>, %13, %cst_5 [1] : vector<8x32xf32> to vector<8xf32>
    %15 = vector.shape_cast %14 : vector<8xf32> to vector<8x1xf32>
    %16 = arith.mulf %10, %12 : vector<8x1xf32>
    %17 = arith.subf %16, %15 : vector<8x1xf32>
    %c0_6 = arith.constant 0 : index
    %c0_7 = arith.constant 0 : index
    %18 = vector.load %arg3[%c0_6, %c0_7] : memref<8x1xf32, #tpu.memory_space<vmem>>, vector<8x1xf32>
    tpu.vector_store %arg3[%c0_6, %c0_7], %17 {strides = array<i32>} : memref<8x1xf32, #tpu.memory_space<vmem>>, vector<8x1xf32>,
    return
  }
  func.func @transform_0(%arg0: i32) -> (i32, i32) {
    %c0_i32 = arith.constant 0 : i32
    %c0_i32_0 = arith.constant 0 : i32
    return %arg0, %c0_i32 : i32, i32
  }
  func.func @transform_1(%arg0: i32) -> (i32, i32) {
    %c0_i32 = arith.constant 0 : i32
    %c0_i32_0 = arith.constant 0 : i32
    return %arg0, %c0_i32 : i32, i32
  }
  func.func @transform_2(%arg0: i32) -> (i32, i32) {
    %c0_i32 = arith.constant 0 : i32
    %c0_i32_0 = arith.constant 0 : i32
    return %arg0, %c0_i32 : i32, i32
  }
}

</mosaic_0001>

<bundles_post_ra>
// kernel: tpu_custom_call.1
= control target key start
LH: loop header
LB: loop body
LE: loop exit
PB: predicated region body
PF: predicated region fallthrough
CT: control target
= control target key end

     0   :  { %7 = vsyncpa [#allocation3], 0  ;;  %s165_s0 = inlined_call_operand.hbm [shape: f32[8,32], index: 0, kind: input, shape index: {}]   ;;  %s166_s1 = inlined_call_operand.hbm [shape: f32[8,32], index: 1, kind: input, shape index: {}]   ;;  %s167_s2 = inlined_call_operand.vmem [shape: f32[8,1], index: 2, kind: output, shape index: {}]  }
   0x1   :  { %8 = vsyncpa [#allocation5], 0  ;;  %s121_s9 = smov [#allocation2]   ;;  %s122_s11 = smov [#allocation4]  }
   0x2   :  { %s15_s10 = sshll.u32 %s121_s9, 4  ;;  %s25_s12 = sshll.u32 %s122_s11, 4  ;;  %s16_s10 = int_to_ptr.vmem [resolvable:$true] %s15_s10  ;;  %s26_s12 = int_to_ptr.vmem [resolvable:$true] %s25_s12 }
   0x3   :  { %s73_s15 = scalar_lea.hbm %s165_s0, 128 }
   0x4   :  { %p74_p0 = scmp.ne.s32.totalorder %s165_s0, %s73_s15  ;;  %p77_p1 = scmp.lt.u32.totalorder %s73_s15, %s165_s0 }
   0x6   :  { %p79_p2 = pnand %p77_p1, %p74_p0 }
   0x8   :  { %82 = shalt.err (!%p79_p2)
}
   0x9   :  { %s83_s20 = scalar_lea.vmem %s16_s10, 128  ;;  %p88_p4 = scmp.lt.s32.totalorder %s16_s10, %s16_s10 }
   0xa   :  { %p84_p3 = scmp.ne.s32.totalorder %s16_s10, %s83_s20  ;;  %p89_p5 = scmp.lt.s32.totalorder %s83_s20, %s83_s20 }
   0xc   :  { %p90_p6 = por %p89_p5, %p88_p4 }
   0xe   :  { %p91_p7 = pnand %p90_p6, %p84_p3 }
  0x10   :  { %94 = shalt.err (!%p91_p7)
}
  0x11   :  { %18 = dma.hbm_to_vmem [thread:$0]  %s165_s0, 128, %s16_s10, [#allocation3]  }
  0x12   :  { %s95_s25 = scalar_lea.hbm %s166_s1, 128 }
  0x13   :  { %p96_p8 = scmp.ne.s32.totalorder %s166_s1, %s95_s25  ;;  %p99_p9 = scmp.lt.u32.totalorder %s95_s25, %s166_s1 }
  0x15   :  { %p101_p10 = pnand %p99_p9, %p96_p8 }
  0x17   :  { %104 = shalt.err (!%p101_p10)
}
  0x18   :  { %s105_s30 = scalar_lea.vmem %s26_s12, 128  ;;  %p110_p12 = scmp.lt.s32.totalorder %s26_s12, %s26_s12 }
  0x19   :  { %p106_p11 = scmp.ne.s32.totalorder %s26_s12, %s105_s30  ;;  %p111_p13 = scmp.lt.s32.totalorder %s105_s30, %s105_s30 }
  0x1b   :  { %p112_p0 = por %p111_p13, %p110_p12 }
  0x1d   :  { %p113_p1 = pnand %p112_p0, %p106_p11 }
  0x1f   :  { %116 = shalt.err (!%p113_p1)
}
  0x20   :  { %28 = dma.hbm_to_vmem [thread:$0]  %s166_s1, 128, %s26_s12, [#allocation5]  }
  0x21   :  { %117 = dma.done.wait [#allocation3], 128  }
  0x22   :  { %118 = vsyncadd [#allocation3], 4294967168 }
  0x23   :  { %119 = dma.done.wait [#allocation5], 128  }
  0x24   :  { %120 = vsyncadd [#allocation5], 4294967168  ;;  %vm37_vm0 = vcmask 261120   ;;  %v35_v0 = vld [vmem:[#allocation2] sm:$0xff]  ;;  %v36_v2 = vld [vmem:[#allocation4] sm:$0xff]  ;;  %vm59_vm1 = vcmask 7168  }
  0x25   :  { %v38_v1 = vsel %vm37_vm0, %v35_v0, -inf  ;;  %v50_v3 = vsel %vm37_vm0, %v36_v2, 0.0  ;;  %v53_v4 = vmul.f32 %v36_v2, %v35_v0 }
  0x26   :  { %39 = vmax.xlane.f32.xlu0 %v38_v1  ;;  %51 = vadd.xlane.f32.xlu1 %v50_v3 }
  0x27   :  { %v54_v5 = vsel %vm37_vm0, %v53_v4, 0.0 }
  0x2a   :  { %55 = vadd.xlane.f32.xlu1 %v54_v5 }
  0xb3   :  { %v40_v6 = vpop.xlane.xlu0 %39  ;;  %v52_v12 = vpop.xlane.xlu1 %51 }
  0xb4   :  { %v41_v7 = vsub.f32 %v35_v0, %v40_v6 }
  0xb6   :  { %v42_v8 = vmul.f32 1.442695, %v41_v7 }
  0xb7   :  { %v56_v16 = vpop.xlane.xlu1 %55 }
  0xb8   :  { %69 = vpow2.f32 %v42_v8 }
  0xc2   :  { %v70_v9 = vpop.eup %69 }
  0xc3   :  { %v44_v10 = vsel %vm37_vm0, %v70_v9, 0.0 }
  0xc4   :  { %45 = vadd.xlane.f32.xlu0 %v44_v10 }
 0x151   :  { %v46_v11 = vpop.xlane.xlu0 %45 }
 0x152   :  { %71 = vlog2.f32 %v46_v11 }
 0x15c   :  { %v72_v13 = vpop.eup %71 }
 0x15d   :  { %v48_v14 = vmul.f32 0.6931472, %v72_v13 }
 0x15f   :  { %v49_v15 = vadd.f32 %v48_v14, %v40_v6 }
 0x161   :  { %v57_v17 = vmul.f32 %v52_v12, %v49_v15 }
 0x163   :  { %v58_v18 = vsub.f32 %v57_v17, %v56_v16 }
 0x165   :  { %60 = vst.msk [vmem:[%s167_s2] sm:$0xff] %vm59_vm1, %v58_v18 }
 0x166   :  { %65 = vsyncpa [#allocation3], 1 }
 0x167   :  { %66 = vsyncpa [#allocation5], 1 }

</bundles_post_ra>
